<compile_context>
chip_gen: v7x
topology: tpu7x:2x2x1
jax: 0.10.0
libtpu: 0.0.40
codegen_flags: <defaults>
</compile_context>

<pallas_src>
import jax
import jax.numpy as jnp
from jax.experimental import pallas as pl
from jax.experimental.pallas import tpu as pltpu

# ----- static model configuration (small, consistent with the module) -----
B        = 8            # batch (fills the 8 sublanes of a vreg)
C, H, W  = 4, 16, 16     # NCHW image
CIN      = C * H * W     # 1024 flattened image size
FEAT     = 16            # feat_dim
HID      = 8             # hid_dim
DEPTH    = 4             # depth (== features.shape[-1])
NCLS     = 10            # num_classes
LANES    = 128
BILIN_K  = HID * FEAT    # bilinear contraction length (exactly one lane width)
N_MID    = DEPTH - 2     # number of middle units / BN layers
N_FREP   = N_MID + 1     # f_rep blocks needed: slices 0..DEPTH-3 and DEPTH-1
EW       = (N_FREP + 1) * LANES   # expansion-slab width (3*128 f_rep + h0 block)
H0_COL   = N_FREP * LANES         # column where first_unit output starts
WW       = 2 * LANES + N_MID * HID  # weight-slab width: EH | wl_pad | wm0 | wm1
WL_COL   = LANES
WM_COL   = 2 * LANES
OUT_PAD  = LANES         # lane-dense padded output width
BN_EPS   = 1e-5
assert BILIN_K == LANES


def ttnet_kernel(x_ref, wfe_ref, eslab_ref, wslab_ref, gb_ref, out_ref):
    """Whole network VMEM-resident; short serialized MXU chain, f32 accumulation."""
    f32 = jnp.float32

    # (1) fused feature extraction: one (B,CIN)bf16 @ (CIN,DEPTH*FEAT)bf16 matmul.
    fall = jnp.dot(x_ref[...], wfe_ref[...], preferred_element_type=f32)  # (B, 64)

    # (2) single pre-loop expansion matmul (everything h-independent, hoisted
    #     off the h -> BN -> h critical chain):
    #       pre[:, i*128:(i+1)*128] = f_rep for feature slice src_i (0, 1, DEPTH-1)
    #       pre[:, H0_COL:H0_COL+HID] = first_unit output h0 (w1 folded into slab)
    pre = jnp.dot(fall, eslab_ref[...], preferred_element_type=f32)       # (B, EW)
    h = pre[:, H0_COL:H0_COL + HID]                                        # (B, HID)

    # (3) small weights: static lane slices of one packed bf16 slab, upcast to f32
    #     so the BatchNorm-sensitive path keeps full precision.
    eh = wslab_ref[0:HID, 0:LANES].astype(f32)                             # (HID, 128)
    wl = wslab_ref[:, WL_COL:WL_COL + LANES].astype(f32)                   # (128, 128)
    gb = gb_ref[...]                                                       # (2*N_MID, HID) f32

    # (4) middle bilinear units + BatchNorm1d (training mode, biased variance).
    #     NB: feature slice index equals the loop index i, exactly as in the module.
    for i in range(N_MID):
        f_rep = pre[:, i * LANES:(i + 1) * LANES]                          # (B, 128)
        wm_i = wslab_ref[:, WM_COL + i * HID:WM_COL + (i + 1) * HID].astype(f32)
        h_rep = jnp.dot(h, eh, preferred_element_type=f32)                 # (B, 128)
        acc = jnp.dot(h_rep * f_rep, wm_i, preferred_element_type=f32)     # (B, HID)
        mean = jnp.mean(acc, axis=0, keepdims=True)
        var = jnp.mean((acc - mean) ** 2, axis=0, keepdims=True)
        h = ((acc - mean) * jax.lax.rsqrt(var + BN_EPS)
             * gb[i:i + 1, :] + gb[N_MID + i:N_MID + i + 1, :])

    # (5) last unit on feature slice DEPTH-1; zero-padded classifier weight
    #     makes the single output store a lane-dense (B, 128) vst.
    f_rep = pre[:, N_MID * LANES:(N_MID + 1) * LANES]
    h_rep = jnp.dot(h, eh, preferred_element_type=f32)
    out_ref[...] = jnp.dot(h_rep * f_rep, wl, preferred_element_type=f32)  # (B, 128)


def prepare_params(wfe, w1, wm, gamma, beta, wl):
    """One-time parameter preparation (all XLA layout plumbing lives here)."""
    f32, bf16 = jnp.float32, jnp.bfloat16

    # fused feature-extractor weight: cols d*FEAT:(d+1)*FEAT == wfe[d]
    wfe2 = jnp.transpose(wfe, (1, 0, 2)).reshape(CIN, DEPTH * FEAT).astype(bf16)

    # expansion slab (DEPTH*FEAT, EW), f32 (exact 0/1 + w1; avoids an in-kernel
    # upcast of a 32-vreg value):   fall @ eslab -> [f_rep(0)|f_rep(1)|f_rep(-1)|h0]
    ef_tile = jnp.tile(jnp.eye(FEAT, dtype=f32), (1, HID))                 # (FEAT, 128)
    eslab = jnp.zeros((DEPTH * FEAT, EW), f32)
    src_slices = list(range(N_MID)) + [DEPTH - 1]                          # [0, 1, 3]
    for blk, s in enumerate(src_slices):
        eslab = eslab.at[s * FEAT:(s + 1) * FEAT,
                         blk * LANES:(blk + 1) * LANES].set(ef_tile)
    eslab = eslab.at[0:FEAT, H0_COL:H0_COL + HID].set(w1.astype(f32))      # fold first_unit

    # packed small-weight slab (128, WW) bf16: [EH (rows 0:HID) | wl_pad | wm0 | wm1]
    eh = jnp.repeat(jnp.eye(HID, dtype=f32), FEAT, axis=1)                 # (HID, 128)
    wmf = jnp.transpose(wm.reshape(N_MID, BILIN_K, HID), (1, 0, 2)).reshape(
        BILIN_K, N_MID * HID)
    wslab = jnp.zeros((BILIN_K, WW), f32)
    wslab = wslab.at[0:HID, 0:LANES].set(eh)
    wslab = wslab.at[:, WL_COL:WL_COL + NCLS].set(wl.reshape(BILIN_K, NCLS).astype(f32))
    wslab = wslab.at[:, WM_COL:WM_COL + N_MID * HID].set(wmf.astype(f32))
    wslab = wslab.astype(bf16)

    # gamma/beta stay f32 (BN-affine precision); rows 0:N_MID gamma, N_MID: beta
    gb = jnp.concatenate([gamma, beta], axis=0).astype(f32)                # (2*N_MID, HID)

    return {"wfe2": wfe2, "eslab": eslab, "wslab": wslab, "gb": gb}


_COST = pl.CostEstimate(
    flops=(2 * B * CIN * (DEPTH * FEAT)            # fused feature matmul
           + 2 * B * (DEPTH * FEAT) * EW           # expansion / first_unit matmul
           + (N_MID + 1) * 2 * B * HID * BILIN_K   # h_rep expansions
           + N_MID * 2 * B * BILIN_K * HID         # middle bilinear contractions
           + 2 * B * BILIN_K * OUT_PAD),           # classifier contraction
    transcendentals=N_MID * HID,                   # rsqrt per BN feature
    bytes_accessed=(B * CIN * 2 + CIN * DEPTH * FEAT * 2 + (DEPTH * FEAT) * EW * 4
                    + BILIN_K * WW * 2 + 2 * N_MID * HID * 4 + B * OUT_PAD * 4),
)


def ttnet_forward(x, params):
    """Per-call path: cast the activation, one Pallas call, slice padded output."""
    assert x.shape[0] == B, "kernel / training-mode BN statistics assume batch == 8"
    xf = x.reshape(B, CIN).astype(jnp.bfloat16)
    vmem = pl.BlockSpec(memory_space=pltpu.MemorySpace.VMEM)
    out_pad = pl.pallas_call(
        ttnet_kernel,
        out_shape=jax.ShapeDtypeStruct((B, OUT_PAD), jnp.float32),
        in_specs=[vmem] * 5,
        out_specs=vmem,
        cost_estimate=_COST,
    )(xf, params["wfe2"], params["eslab"], params["wslab"], params["gb"])
    return out_pad[:, :NCLS]


def ttnet_reference(x, wfe, w1, wm, gamma, beta, wl):
    """Pure-JAX reference mirroring the PyTorch forward (training-mode BN)."""
    P = jax.lax.Precision.HIGHEST
    xf = x.reshape(x.shape[0], -1).astype(jnp.float32)
    feats = jnp.einsum('bc,dcf->bdf', xf, wfe, precision=P)  # feats[:, d, :] == features[:, :, d]
    h = jnp.dot(feats[:, 0, :], w1, precision=P)             # first_unit on ones(B, 1)
    for i in range(DEPTH - 2):
        acc = jnp.einsum('bp,pjk,bj->bk', h, wm[i], feats[:, i, :], precision=P)
        mean = acc.mean(0, keepdims=True)
        var = ((acc - mean) ** 2).mean(0, keepdims=True)
        h = (acc - mean) / jnp.sqrt(var + BN_EPS) * gamma[i] + beta[i]
    return jnp.einsum('bp,pjk,bj->bk', h, wl, feats[:, -1, :], precision=P)


if __name__ == "__main__":
    key = jax.random.PRNGKey(0)
    kx, kfe, k1, km, kg, kb, kl = jax.random.split(key, 7)

    def bf16_grid(a):
        # keep bf16-fed values exactly bf16-representable so the kernel and the
        # f32 reference differ only by accumulation order, not quantization.
        return a.astype(jnp.bfloat16).astype(jnp.float32)

    # deterministic inputs & parameters (shapes dictated by the module's __init__)
    x = bf16_grid(jax.random.normal(kx, (B, C, H, W), jnp.float32))            # NCHW image
    # pluggable feature extractor realized as flatten + per-depth linear proj
    wfe = bf16_grid(jax.random.normal(kfe, (DEPTH, CIN, FEAT), jnp.float32) * 0.02)
    # first_unit weight, PyTorch (hid, 1, feat) -> stored (feat, hid)
    w1 = bf16_grid(jax.random.normal(k1, (FEAT, HID), jnp.float32) * 0.1)
    # middle_units weights, PyTorch (hid_out, hid_in, feat) -> stored (layer, p, j, k)
    wm = bf16_grid(jax.random.normal(km, (N_MID, HID, FEAT, HID), jnp.float32) * 0.1)
    # BatchNorm1d affine params (kept f32 end-to-end)
    gamma = 1.0 + 0.1 * jax.random.normal(kg, (N_MID, HID), jnp.float32)
    beta = 0.05 * jax.random.normal(kb, (N_MID, HID), jnp.float32)
    # last_unit weight, PyTorch (num_classes, hid, feat) -> stored (p, j, k)
    wl = bf16_grid(jax.random.normal(kl, (HID, FEAT, NCLS), jnp.float32) * 0.1)

    params = prepare_params(wfe, w1, wm, gamma, beta, wl)   # one-time prep, reused
    forward = jax.jit(ttnet_forward)

    out = jax.block_until_ready(forward(x, params))
    ref = jax.block_until_ready(ttnet_reference(x, wfe, w1, wm, gamma, beta, wl))

    assert out.shape == (B, NCLS)
    assert jnp.allclose(out, ref, rtol=1e-3, atol=1e-3), (out, ref)
    print("KERNEL_OK")
</pallas_src>

<mosaic_0001>
module attributes {stable_mosaic.version = 11 : i64} {
  func.func @ttnet_kernel(%arg0: memref<8x1024xbf16, #tpu.memory_space<vmem>>, %arg1: memref<1024x64xbf16, #tpu.memory_space<vmem>>, %arg2: memref<64x512xf32, #tpu.memory_space<vmem>>, %arg3: memref<128x272xbf16, #tpu.memory_space<vmem>>, %arg4: memref<4x8xf32, #tpu.memory_space<vmem>>, %arg5: memref<8x128xf32, #tpu.memory_space<vmem>>) attributes {dimension_semantics = [], scalar_prefetch = 0 : i64, scratch_operands = 0 : i64, tpu.core_type = #tpu.core_type<tc>} {
    %c0 = arith.constant 0 : index
    %c0_0 = arith.constant 0 : index
    %0 = vector.load %arg0[%c0, %c0_0] : memref<8x1024xbf16, #tpu.memory_space<vmem>>, vector<8x1024xbf16>
    %c0_1 = arith.constant 0 : index
    %c0_2 = arith.constant 0 : index
    %1 = vector.load %arg1[%c0_1, %c0_2] : memref<1024x64xbf16, #tpu.memory_space<vmem>>, vector<1024x64xbf16>
    %cst = arith.constant dense<0.000000e+00> : vector<8x64xf32>
    %2 = tpu.matmul %0, %1, %cst {dimension_numbers = #tpu.dot_dimension_numbers<[1], [0], [0], [1], [0, 0, 1, 1], [], []>} : vector<8x1024xbf16>, vector<1024x64xbf16>, vector<8x64xf32> -> vector<8x64xf32>
    %c0_3 = arith.constant 0 : index
    %c0_4 = arith.constant 0 : index
    %3 = vector.load %arg2[%c0_3, %c0_4] : memref<64x512xf32, #tpu.memory_space<vmem>>, vector<64x512xf32>
    %cst_5 = arith.constant dense<0.000000e+00> : vector<8x512xf32>
    %4 = tpu.matmul %2, %3, %cst_5 {dimension_numbers = #tpu.dot_dimension_numbers<[1], [0], [0], [1], [0, 0, 1, 1], [], []>} : vector<8x64xf32>, vector<64x512xf32>, vector<8x512xf32> -> vector<8x512xf32>
    %5 = vector.extract_strided_slice %4 {offsets = [0, 384], sizes = [8, 8], strides = [1, 1]} : vector<8x512xf32> to vector<8x8xf32>
    %c0_6 = arith.constant 0 : index
    %c0_7 = arith.constant 0 : index
    %6 = vector.load %arg3[%c0_6, %c0_7] : memref<128x272xbf16, #tpu.memory_space<vmem>>, vector<8x128xbf16>
    %7 = arith.extf %6 : vector<8x128xbf16> to vector<8x128xf32>
    %c0_8 = arith.constant 0 : index
    %c128 = arith.constant 128 : index
    %8 = vector.load %arg3[%c0_8, %c128] : memref<128x272xbf16, #tpu.memory_space<vmem>>, vector<128x128xbf16>
    %9 = arith.extf %8 : vector<128x128xbf16> to vector<128x128xf32>
    %c0_9 = arith.constant 0 : index
    %c0_10 = arith.constant 0 : index
    %10 = vector.load %arg4[%c0_9, %c0_10] : memref<4x8xf32, #tpu.memory_space<vmem>>, vector<4x8xf32>
    %11 = vector.extract_strided_slice %4 {offsets = [0, 0], sizes = [8, 128], strides = [1, 1]} : vector<8x512xf32> to vector<8x128xf32>
    %c0_11 = arith.constant 0 : index
    %c256 = arith.constant 256 : index
    %12 = vector.load %arg3[%c0_11, %c256] : memref<128x272xbf16, #tpu.memory_space<vmem>>, vector<128x8xbf16>
    %13 = arith.extf %12 : vector<128x8xbf16> to vector<128x8xf32>
    %cst_12 = arith.constant dense<0.000000e+00> : vector<8x128xf32>
    %14 = tpu.matmul %5, %7, %cst_12 {dimension_numbers = #tpu.dot_dimension_numbers<[1], [0], [0], [1], [0, 0, 1, 1], [], []>} : vector<8x8xf32>, vector<8x128xf32>, vector<8x128xf32> -> vector<8x128xf32>
    %15 = arith.mulf %14, %11 : vector<8x128xf32>
    %cst_13 = arith.constant dense<0.000000e+00> : vector<8x8xf32>
    %16 = tpu.matmul %15, %13, %cst_13 {dimension_numbers = #tpu.dot_dimension_numbers<[1], [0], [0], [1], [0, 0, 1, 1], [], []>} : vector<8x128xf32>, vector<128x8xf32>, vector<8x8xf32> -> vector<8x8xf32>
    %cst_14 = arith.constant dense<0.000000e+00> : vector<8xf32>
    %17 = vector.multi_reduction <add>, %16, %cst_14 [0] : vector<8x8xf32> to vector<8xf32>
    %18 = vector.shape_cast %17 : vector<8xf32> to vector<1x8xf32>
    %cst_15 = arith.constant 8.000000e+00 : f32
    %19 = vector.broadcast %cst_15 : f32 to vector<1x8xf32>
    %20 = arith.divf %18, %19 : vector<1x8xf32>
    %21 = vector.broadcast %20 : vector<1x8xf32> to vector<8x8xf32>
    %22 = arith.subf %16, %21 : vector<8x8xf32>
    %23 = arith.mulf %22, %22 : vector<8x8xf32>
    %cst_16 = arith.constant dense<0.000000e+00> : vector<8xf32>
    %24 = vector.multi_reduction <add>, %23, %cst_16 [0] : vector<8x8xf32> to vector<8xf32>
    %25 = vector.shape_cast %24 : vector<8xf32> to vector<1x8xf32>
    %cst_17 = arith.constant 8.000000e+00 : f32
    %26 = vector.broadcast %cst_17 : f32 to vector<1x8xf32>
    %27 = arith.divf %25, %26 : vector<1x8xf32>
    %28 = vector.broadcast %20 : vector<1x8xf32> to vector<8x8xf32>
    %29 = arith.subf %16, %28 : vector<8x8xf32>
    %cst_18 = arith.constant 9.99999974E-6 : f32
    %30 = vector.broadcast %cst_18 : f32 to vector<1x8xf32>
    %31 = arith.addf %27, %30 : vector<1x8xf32>
    %32 = math.rsqrt %31 : vector<1x8xf32>
    %33 = vector.broadcast %32 : vector<1x8xf32> to vector<8x8xf32>
    %34 = arith.mulf %29, %33 : vector<8x8xf32>
    %35 = vector.extract_strided_slice %10 {offsets = [0, 0], sizes = [1, 8], strides = [1, 1]} : vector<4x8xf32> to vector<1x8xf32>
    %36 = vector.broadcast %35 : vector<1x8xf32> to vector<8x8xf32>
    %37 = arith.mulf %34, %36 : vector<8x8xf32>
    %38 = vector.extract_strided_slice %10 {offsets = [2, 0], sizes = [1, 8], strides = [1, 1]} : vector<4x8xf32> to vector<1x8xf32>
    %39 = vector.broadcast %38 : vector<1x8xf32> to vector<8x8xf32>
    %40 = arith.addf %37, %39 : vector<8x8xf32>
    %41 = vector.extract_strided_slice %4 {offsets = [0, 128], sizes = [8, 128], strides = [1, 1]} : vector<8x512xf32> to vector<8x128xf32>
    %c0_19 = arith.constant 0 : index
    %c264 = arith.constant 264 : index
    %42 = vector.load %arg3[%c0_19, %c264] : memref<128x272xbf16, #tpu.memory_space<vmem>>, vector<128x8xbf16>
    %43 = arith.extf %42 : vector<128x8xbf16> to vector<128x8xf32>
    %cst_20 = arith.constant dense<0.000000e+00> : vector<8x128xf32>
    %44 = tpu.matmul %40, %7, %cst_20 {dimension_numbers = #tpu.dot_dimension_numbers<[1], [0], [0], [1], [0, 0, 1, 1], [], []>} : vector<8x8xf32>, vector<8x128xf32>, vector<8x128xf32> -> vector<8x128xf32>
    %45 = arith.mulf %44, %41 : vector<8x128xf32>
    %cst_21 = arith.constant dense<0.000000e+00> : vector<8x8xf32>
    %46 = tpu.matmul %45, %43, %cst_21 {dimension_numbers = #tpu.dot_dimension_numbers<[1], [0], [0], [1], [0, 0, 1, 1], [], []>} : vector<8x128xf32>, vector<128x8xf32>, vector<8x8xf32> -> vector<8x8xf32>
    %cst_22 = arith.constant dense<0.000000e+00> : vector<8xf32>
    %47 = vector.multi_reduction <add>, %46, %cst_22 [0] : vector<8x8xf32> to vector<8xf32>
    %48 = vector.shape_cast %47 : vector<8xf32> to vector<1x8xf32>
    %cst_23 = arith.constant 8.000000e+00 : f32
    %49 = vector.broadcast %cst_23 : f32 to vector<1x8xf32>
    %50 = arith.divf %48, %49 : vector<1x8xf32>
    %51 = vector.broadcast %50 : vector<1x8xf32> to vector<8x8xf32>
    %52 = arith.subf %46, %51 : vector<8x8xf32>
    %53 = arith.mulf %52, %52 : vector<8x8xf32>
    %cst_24 = arith.constant dense<0.000000e+00> : vector<8xf32>
    %54 = vector.multi_reduction <add>, %53, %cst_24 [0] : vector<8x8xf32> to vector<8xf32>
    %55 = vector.shape_cast %54 : vector<8xf32> to vector<1x8xf32>
    %cst_25 = arith.constant 8.000000e+00 : f32
    %56 = vector.broadcast %cst_25 : f32 to vector<1x8xf32>
    %57 = arith.divf %55, %56 : vector<1x8xf32>
    %58 = vector.broadcast %50 : vector<1x8xf32> to vector<8x8xf32>
    %59 = arith.subf %46, %58 : vector<8x8xf32>
    %cst_26 = arith.constant 9.99999974E-6 : f32
    %60 = vector.broadcast %cst_26 : f32 to vector<1x8xf32>
    %61 = arith.addf %57, %60 : vector<1x8xf32>
    %62 = math.rsqrt %61 : vector<1x8xf32>
    %63 = vector.broadcast %62 : vector<1x8xf32> to vector<8x8xf32>
    %64 = arith.mulf %59, %63 : vector<8x8xf32>
    %65 = vector.extract_strided_slice %10 {offsets = [1, 0], sizes = [1, 8], strides = [1, 1]} : vector<4x8xf32> to vector<1x8xf32>
    %66 = vector.broadcast %65 : vector<1x8xf32> to vector<8x8xf32>
    %67 = arith.mulf %64, %66 : vector<8x8xf32>
    %68 = vector.extract_strided_slice %10 {offsets = [3, 0], sizes = [1, 8], strides = [1, 1]} : vector<4x8xf32> to vector<1x8xf32>
    %69 = vector.broadcast %68 : vector<1x8xf32> to vector<8x8xf32>
    %70 = arith.addf %67, %69 : vector<8x8xf32>
    %71 = vector.extract_strided_slice %4 {offsets = [0, 256], sizes = [8, 128], strides = [1, 1]} : vector<8x512xf32> to vector<8x128xf32>
    %cst_27 = arith.constant dense<0.000000e+00> : vector<8x128xf32>
    %72 = tpu.matmul %70, %7, %cst_27 {dimension_numbers = #tpu.dot_dimension_numbers<[1], [0], [0], [1], [0, 0, 1, 1], [], []>} : vector<8x8xf32>, vector<8x128xf32>, vector<8x128xf32> -> vector<8x128xf32>
    %73 = arith.mulf %72, %71 : vector<8x128xf32>
    %cst_28 = arith.constant dense<0.000000e+00> : vector<8x128xf32>
    %74 = tpu.matmul %73, %9, %cst_28 {dimension_numbers = #tpu.dot_dimension_numbers<[1], [0], [0], [1], [0, 0, 1, 1], [], []>} : vector<8x128xf32>, vector<128x128xf32>, vector<8x128xf32> -> vector<8x128xf32>
    %c0_29 = arith.constant 0 : index
    %c0_30 = arith.constant 0 : index
    %75 = vector.load %arg5[%c0_29, %c0_30] : memref<8x128xf32, #tpu.memory_space<vmem>>, vector<8x128xf32>
    tpu.vector_store %arg5[%c0_29, %c0_30], %74 {strides = array<i32>} : memref<8x128xf32, #tpu.memory_space<vmem>>, vector<8x128xf32>,
    return
  }
}

</mosaic_0001>

<bundles_post_ra>
// kernel: ttnet_forward.1
= control target key start
LH: loop header
LB: loop body
LE: loop exit
PB: predicated region body
PF: predicated region fallthrough
CT: control target
= control target key end

     0   :  { %s2690_s0 = inlined_call_operand.vmem [shape: bf16[8,1024], index: 0, kind: input, shape index: {}]   ;;  %s2691_s1 = inlined_call_operand.vmem [shape: bf16[1024,64], index: 1, kind: input, shape index: {}]   ;;  %s2692_s2 = inlined_call_operand.vmem [shape: f32[64,512], index: 2, kind: input, shape index: {}]   ;;  %s2693_s3 = inlined_call_operand.vmem [shape: bf16[128,272], index: 3, kind: input, shape index: {}]   ;;  %s2694_s4 = inlined_call_operand.vmem [shape: f32[4,8], index: 4, kind: input, shape index: {}]   ;;  %s2695_s5 = inlined_call_operand.hbm [shape: f32[8,128], index: 5, kind: output, shape index: {}]  }
   0x1   :  { %v2063_v0 = vld [vmem:[%s2691_s1 + $0x40] sm:$0xff]   ;;  %v2067_v4 = vld [vmem:[%s2691_s1 + $0x48] sm:$0xff]   ;;  %v2071_v8 = vld [vmem:[%s2691_s1 + $0x50] sm:$0xff]  }
   0x2   :  { %v2064_v1 = vld [vmem:[%s2691_s1 + $0xc0] sm:$0xff]   ;;  %1627 = vmatprep.subr.bf16.mxu0 %v2063_v0  ;;  %v2068_v5 = vld [vmem:[%s2691_s1 + $0xc8] sm:$0xff]   ;;  %v2072_v9 = vld [vmem:[%s2691_s1 + $0xd0] sm:$0xff]  }
   0x3   :  { %v2065_v2 = vld [vmem:[%s2691_s1] sm:$0xff]   ;;  %1649 = vmatprep.subr.bf16.mxu1 %v2064_v1  ;;  %v2069_v6 = vld [vmem:[%s2691_s1 + $0x8] sm:$0xff]   ;;  %v2073_v10 = vld [vmem:[%s2691_s1 + $0x10] sm:$0xff]  }
   0x4   :  { %v2066_v3 = vld [vmem:[%s2691_s1 + $0x80] sm:$0xff]   ;;  %1628 = vmatpush3.bf16.msra.mxu0 %v2065_v2  ;;  %v2070_v7 = vld [vmem:[%s2691_s1 + $0x88] sm:$0xff]   ;;  %v2074_v11 = vld [vmem:[%s2691_s1 + $0x90] sm:$0xff]  }
   0x5   :  { %1650 = vmatpush3.bf16.msra.mxu1 %v2066_v3  ;;  %1629 = vmatprep.subr.bf16.mxu0 %v2067_v4  ;;  %v2075_v12 = vld [vmem:[%s2691_s1 + $0x58] sm:$0xff]   ;;  %v2079_v16 = vld [vmem:[%s2691_s1 + $0x60] sm:$0xff]   ;;  %v2083_v20 = vld [vmem:[%s2691_s1 + $0x68] sm:$0xff]  }
   0x6   :  { %1651 = vmatprep.subr.bf16.mxu1 %v2068_v5  ;;  %v2076_v13 = vld [vmem:[%s2691_s1 + $0xd8] sm:$0xff]   ;;  %v2080_v17 = vld [vmem:[%s2691_s1 + $0xe0] sm:$0xff]   ;;  %v2084_v21 = vld [vmem:[%s2691_s1 + $0xe8] sm:$0xff]  }
   0x7   :  { %v2077_v14 = vld [vmem:[%s2691_s1 + $0x18] sm:$0xff]   ;;  %v2081_v18 = vld [vmem:[%s2691_s1 + $0x20] sm:$0xff]   ;;  %v2085_v22 = vld [vmem:[%s2691_s1 + $0x28] sm:$0xff]  }
   0x8   :  { %1630 = vmatpush3.bf16.msra.mxu0 %v2069_v6  ;;  %v2078_v15 = vld [vmem:[%s2691_s1 + $0x98] sm:$0xff]   ;;  %v2082_v19 = vld [vmem:[%s2691_s1 + $0xa0] sm:$0xff]   ;;  %v2086_v23 = vld [vmem:[%s2691_s1 + $0xa8] sm:$0xff]  }
   0x9   :  { %1652 = vmatpush3.bf16.msra.mxu1 %v2070_v7  ;;  %1631 = vmatprep.subr.bf16.mxu0 %v2071_v8  ;;  %v2087_v24 = vld [vmem:[%s2691_s1 + $0x70] sm:$0xff]   ;;  %v2091_v28 = vld [vmem:[%s2691_s1 + $0x78] sm:$0xff]   ;;  %v22_v32 = vld [vmem:[%s2690_s0] sm:$0xff] }
   0xa   :  { %1653 = vmatprep.subr.bf16.mxu1 %v2072_v9  ;;  %v2088_v25 = vld [vmem:[%s2691_s1 + $0xf0] sm:$0xff]   ;;  %v2092_v29 = vld [vmem:[%s2691_s1 + $0xf8] sm:$0xff]   ;;  %v23_v33 = vld [vmem:[%s2690_s0 + $0x8] sm:$0xff]  ;;  %v1546_v34 = vcombine.low %v22_v32, %v22_v32  ;;  %v1547_v35 = vcombine.high %v22_v32, %v22_v32 }
   0xb   :  { %v2089_v26 = vld [vmem:[%s2691_s1 + $0x30] sm:$0xff]   ;;  %v2093_v30 = vld [vmem:[%s2691_s1 + $0x38] sm:$0xff]   ;;  %v1548_v36 = vcombine.low %v23_v33, %v23_v33  ;;  %v1549_v37 = vcombine.high %v23_v33, %v23_v33  ;;  %v2099_v38 = vld [vmem:[%s2691_s1 + $0x140] sm:$0xff]  }
   0xc   :  { %1632 = vmatpush3.bf16.msra.mxu0 %v2073_v10  ;;  %v2090_v27 = vld [vmem:[%s2691_s1 + $0xb0] sm:$0xff]   ;;  %v2094_v31 = vld [vmem:[%s2691_s1 + $0xb8] sm:$0xff]   ;;  %v2100_v39 = vld [vmem:[%s2691_s1 + $0x1c0] sm:$0xff]   ;;  %598 = vmatprep.mubr.bf16.mxu0 %v1547_v35 }
   0xd   :  { %1654 = vmatpush3.bf16.msra.mxu1 %v2074_v11  ;;  %1633 = vmatprep.subr.bf16.mxu0 %v2075_v12  ;;  %v2101_v40 = vld [vmem:[%s2691_s1 + $0x100] sm:$0xff]   ;;  %v2103_v42 = vld [vmem:[%s2691_s1 + $0x148] sm:$0xff]   ;;  %v2107_v46 = vld [vmem:[%s2691_s1 + $0x150] sm:$0xff]  }
   0xe   :  { %1655 = vmatprep.subr.bf16.mxu1 %v2076_v13  ;;  %638 = vmatprep.mubr.bf16.mxu1 %v1549_v37  ;;  %v2102_v41 = vld [vmem:[%s2691_s1 + $0x180] sm:$0xff]   ;;  %v2104_v43 = vld [vmem:[%s2691_s1 + $0x1c8] sm:$0xff]   ;;  %v2108_v47 = vld [vmem:[%s2691_s1 + $0x1d0] sm:$0xff]  }
   0xf   :  { %v2105_v44 = vld [vmem:[%s2691_s1 + $0x108] sm:$0xff]   ;;  %v2109_v48 = vld [vmem:[%s2691_s1 + $0x110] sm:$0xff]   ;;  %v2111_v50 = vld [vmem:[%s2691_s1 + $0x158] sm:$0xff]  }
  0x10   :  { %1634 = vmatpush3.bf16.msra.mxu0 %v2077_v14  ;;  %v2106_v45 = vld [vmem:[%s2691_s1 + $0x188] sm:$0xff]   ;;  %v2110_v49 = vld [vmem:[%s2691_s1 + $0x190] sm:$0xff]   ;;  %v2112_v51 = vld [vmem:[%s2691_s1 + $0x1d8] sm:$0xff]  }
  0x11   :  { %1656 = vmatpush3.bf16.msra.mxu1 %v2078_v15  ;;  %1635 = vmatprep.subr.bf16.mxu0 %v2079_v16  ;;  %v2113_v52 = vld [vmem:[%s2691_s1 + $0x118] sm:$0xff]   ;;  %v2115_v54 = vld [vmem:[%s2691_s1 + $0x160] sm:$0xff]   ;;  %v2119_v58 = vld [vmem:[%s2691_s1 + $0x168] sm:$0xff]  }
  0x12   :  { %1657 = vmatprep.subr.bf16.mxu1 %v2080_v17  ;;  %v2114_v53 = vld [vmem:[%s2691_s1 + $0x198] sm:$0xff]   ;;  %v2116_v55 = vld [vmem:[%s2691_s1 + $0x1e0] sm:$0xff]   ;;  %v2120_v59 = vld [vmem:[%s2691_s1 + $0x1e8] sm:$0xff]  }
  0x13   :  { %v2117_v56 = vld [vmem:[%s2691_s1 + $0x120] sm:$0xff]   ;;  %v2121_v60 = vld [vmem:[%s2691_s1 + $0x128] sm:$0xff]   ;;  %v2123_v62 = vld [vmem:[%s2691_s1 + $0x170] sm:$0xff]  }
  0x14   :  { %1636 = vmatpush3.bf16.msra.mxu0 %v2081_v18  ;;  %v2118_v57 = vld [vmem:[%s2691_s1 + $0x1a0] sm:$0xff]   ;;  %v2122_v61 = vld [vmem:[%s2691_s1 + $0x1a8] sm:$0xff]   ;;  %v2124_v63 = vld [vmem:[%s2691_s1 + $0x1f0] sm:$0xff]  }
  0x15   :  { %1658 = vmatpush3.bf16.msra.mxu1 %v2082_v19  ;;  %1637 = vmatprep.subr.bf16.mxu0 %v2083_v20  ;;  %v2125_v0 = vld [vmem:[%s2691_s1 + $0x130] sm:$0xff]   ;;  %v2127_v2 = vld [vmem:[%s2691_s1 + $0x178] sm:$0xff]  }
  0x16   :  { %1659 = vmatprep.subr.bf16.mxu1 %v2084_v21  ;;  %v2126_v1 = vld [vmem:[%s2691_s1 + $0x1b0] sm:$0xff]   ;;  %v2128_v3 = vld [vmem:[%s2691_s1 + $0x1f8] sm:$0xff]  }
  0x17   :  { %v2129_v4 = vld [vmem:[%s2691_s1 + $0x138] sm:$0xff]   ;;  %v24_v6 = vld [vmem:[%s2690_s0 + $0x10] sm:$0xff] }
  0x18   :  { %1638 = vmatpush3.bf16.msra.mxu0 %v2085_v22  ;;  %v2130_v5 = vld [vmem:[%s2691_s1 + $0x1b8] sm:$0xff]   ;;  %v1550_v7 = vcombine.low %v24_v6, %v24_v6  ;;  %v1551_v8 = vcombine.high %v24_v6, %v24_v6 }
  0x19   :  { %1660 = vmatpush3.bf16.msra.mxu1 %v2086_v23  ;;  %1639 = vmatprep.subr.bf16.mxu0 %v2087_v24  ;;  %v25_v9 = vld [vmem:[%s2690_s0 + $0x18] sm:$0xff] }
  0x1a   :  { %1661 = vmatprep.subr.bf16.mxu1 %v2088_v25  ;;  %v1552_v10 = vcombine.low %v25_v9, %v25_v9  ;;  %v1553_v11 = vcombine.high %v25_v9, %v25_v9 }
  0x1c   :  { %1640 = vmatpush3.bf16.msra.mxu0 %v2089_v26 }
  0x1d   :  { %1662 = vmatpush3.bf16.msra.mxu1 %v2090_v27  ;;  %1641 = vmatprep.subr.bf16.mxu0 %v2091_v28 }
  0x1e   :  { %1663 = vmatprep.subr.bf16.mxu1 %v2092_v29 }
  0x20   :  { %1642 = vmatpush3.bf16.msra.mxu0 %v2093_v30 }
  0x21   :  { %1664 = vmatpush3.bf16.msra.mxu1 %v2094_v31  ;;  %1671 = vmatprep.subr.bf16.mxu0 %v2099_v38 }
  0x22   :  { %1693 = vmatprep.subr.bf16.mxu1 %v2100_v39 }
  0x23   :  { %599 = vmatmul.mubr.bf16.vlgmr.msra.gmra.mrb[0].mxu0 %v1546_v34 }
  0x24   :  { %639 = vmatmul.mubr.bf16.vlgmr.msra.gmra.mrb[0].mxu1 %v1548_v36  ;;  %1672 = vmatpush3.bf16.msra.mxu0 %v2101_v40 }
  0x25   :  { %1694 = vmatpush3.bf16.msra.mxu1 %v2102_v41  ;;  %1673 = vmatprep.subr.bf16.mxu0 %v2103_v42 }
  0x26   :  { %1695 = vmatprep.subr.bf16.mxu1 %v2104_v43  ;;  %678 = vmatprep.mubr.bf16.mxu0 %v1551_v8 }
  0x27   :  { %718 = vmatprep.mubr.bf16.mxu1 %v1553_v11 }
  0x28   :  { %1674 = vmatpush3.bf16.msra.mxu0 %v2105_v44 }
  0x29   :  { %1696 = vmatpush3.bf16.msra.mxu1 %v2106_v45  ;;  %1675 = vmatprep.subr.bf16.mxu0 %v2107_v46 }
  0x2a   :  { %1697 = vmatprep.subr.bf16.mxu1 %v2108_v47 }
  0x2c   :  { %1676 = vmatpush3.bf16.msra.mxu0 %v2109_v48 }
  0x2d   :  { %1698 = vmatpush3.bf16.msra.mxu1 %v2110_v49  ;;  %1677 = vmatprep.subr.bf16.mxu0 %v2111_v50 }
  0x2e   :  { %1699 = vmatprep.subr.bf16.mxu1 %v2112_v51 }
  0x30   :  { %1678 = vmatpush3.bf16.msra.mxu0 %v2113_v52 }
  0x31   :  { %1700 = vmatpush3.bf16.msra.mxu1 %v2114_v53  ;;  %1679 = vmatprep.subr.bf16.mxu0 %v2115_v54 }
  0x32   :  { %1701 = vmatprep.subr.bf16.mxu1 %v2116_v55 }
  0x34   :  { %1680 = vmatpush3.bf16.msra.mxu0 %v2117_v56 }
  0x35   :  { %1702 = vmatpush3.bf16.msra.mxu1 %v2118_v57  ;;  %1681 = vmatprep.subr.bf16.mxu0 %v2119_v58 }
  0x36   :  { %1703 = vmatprep.subr.bf16.mxu1 %v2120_v59 }
  0x38   :  { %1682 = vmatpush3.bf16.msra.mxu0 %v2121_v60 }
  0x39   :  { %1704 = vmatpush3.bf16.msra.mxu1 %v2122_v61  ;;  %1683 = vmatprep.subr.bf16.mxu0 %v2123_v62 }
  0x3a   :  { %1705 = vmatprep.subr.bf16.mxu1 %v2124_v63 }
  0x3c   :  { %1684 = vmatpush3.bf16.msra.mxu0 %v2125_v0 }
  0x3d   :  { %1706 = vmatpush3.bf16.msra.mxu1 %v2126_v1  ;;  %1685 = vmatprep.subr.bf16.mxu0 %v2127_v2 }
  0x3e   :  { %1707 = vmatprep.subr.bf16.mxu1 %v2128_v3 }
  0x40   :  { %1686 = vmatpush3.bf16.msra.mxu0 %v2129_v4 }
  0x41   :  { %1708 = vmatpush3.bf16.msra.mxu1 %v2130_v5 }
  0x43   :  { %679 = vmatmul.mubr.bf16.vlgmr.msra.gmra.mrb[4].mxu0 %v1550_v7 }
  0x44   :  { %719 = vmatmul.mubr.bf16.vlgmr.msra.gmra.mrb[4].mxu1 %v1552_v10 }
  0x45   :  { %10 = vsyncpa [#allocation3], 0  ;;  %v727_v12 = vld [vmem:[%s2692_s2 + $0x8] sm:$0xff]  ;;  %v726_v14 = vld [vmem:[%s2692_s2] sm:$0xff]  ;;  %v2178_v39 = vmov 0.0   ;;  %vm758_vm0 = vcmask 523264  }
  0x46   :  { %v731_v13 = vld [vmem:[%s2692_s2 + $0x28] sm:$0xff]  ;;  %v730_v16 = vld [vmem:[%s2692_s2 + $0x20] sm:$0xff]  ;;  %v729_v36 = vld [vmem:[%s2692_s2 + $0x18] sm:$0xff]  ;;  %826 = vmatprep.mubr.f32.mxu0 %v2178_v39  ;;  %vm2179_vm1 = vmmov 0   ;;  %vm971_vm2 = vcmask 64512   ;;  %s2181_s17 = smov 120  }
  0x47   :  { %v1892_v15 = vpack.c.bf16 %v731_v13, %v727_v12  ;;  %v735_v17 = vld [vmem:[%s2692_s2 + $0x48] sm:$0xff]  ;;  %v1894_v19 = vpack.c.bf16 %v730_v16, %v726_v14  ;;  %v734_v21 = vld [vmem:[%s2692_s2 + $0x40] sm:$0xff]  ;;  %v733_v37 = vld [vmem:[%s2692_s2 + $0x38] sm:$0xff]  ;;  %1809 = vmatprep.mubr.msk.f32.mxu1 %vm2179_vm1, %v2178_v39  ;;  %s2182_s10 = smov [#allocation2]  }
  0x48   :  { %v739_v18 = vld [vmem:[%s2692_s2 + $0x68] sm:$0xff]  ;;  %v738_v22 = vld [vmem:[%s2692_s2 + $0x60] sm:$0xff]  ;;  %v1908_v38 = vpack.c.bf16 %v733_v37, %v729_v36  ;;  %v728_v59 = vld [vmem:[%s2692_s2 + $0x10] sm:$0xff]  ;;  %s1538_s11 = sshll.u32 %s2182_s10, 4  ;;  %s1539_s11 = int_to_ptr.vmem [resolvable:$true] %s1538_s11 }
  0x49   :  { %v1896_v20 = vpack.c.bf16 %v739_v18, %v735_v17  ;;  %v743_v23 = vld [vmem:[%s2692_s2 + $0x88] sm:$0xff]  ;;  %1893 = vmatprep.subr.bf16.mxu0 %v1892_v15  ;;  %v1898_v25 = vpack.c.bf16 %v738_v22, %v734_v21  ;;  %v742_v27 = vld [vmem:[%s2692_s2 + $0x80] sm:$0xff]  ;;  %v732_v60 = vld [vmem:[%s2692_s2 + $0x30] sm:$0xff]  ;;  %s2154_s12 = scalar_lea.vmem %s1539_s11, 128  ;;  %p2159_p1 = scmp.lt.s32.totalorder %s1539_s11, %s1539_s11 }
  0x4a   :  { %v747_v24 = vld [vmem:[%s2692_s2 + $0xa8] sm:$0xff]  ;;  %1895 = vmatpush1.bf16.msra.mxu0 %v1894_v19  ;;  %v746_v28 = vld [vmem:[%s2692_s2 + $0xa0] sm:$0xff]  ;;  %v737_v63 = vld [vmem:[%s2692_s2 + $0x58] sm:$0xff]  ;;  %v1910_v2 = vpack.c.bf16 %v732_v60, %v728_v59  ;;  %p2155_p0 = scmp.ne.s32.totalorder %s1539_s11, %s2154_s12  ;;  %p2160_p2 = scmp.lt.s32.totalorder %s2154_s12, %s2154_s12 }
  0x4b   :  { %1897 = vmatprep.subr.bf16.mxu0 %v1896_v20  ;;  %v1900_v26 = vpack.c.bf16 %v747_v24, %v743_v23  ;;  %v1902_v29 = vpack.c.bf16 %v746_v28, %v742_v27  ;;  %v751_v30 = vld [vmem:[%s2692_s2 + $0xc8] sm:$0xff]  ;;  %v750_v33 = vld [vmem:[%s2692_s2 + $0xc0] sm:$0xff]  ;;  %v741_v0 = vld [vmem:[%s2692_s2 + $0x78] sm:$0xff]  ;;  %v2180_v24 = vmov 0.0|0.0  }
  0x4c   :  { %v755_v31 = vld [vmem:[%s2692_s2 + $0xe8] sm:$0xff]  ;;  %v754_v34 = vld [vmem:[%s2692_s2 + $0xe0] sm:$0xff]  ;;  %v1912_v4 = vpack.c.bf16 %v741_v0, %v737_v63  ;;  %v736_v5 = vld [vmem:[%s2692_s2 + $0x50] sm:$0xff]  ;;  %1924 = vmatprep.subr.bf16.mxu1 %v2180_v24  ;;  %p2161_p3 = por %p2160_p2, %p2159_p1 }
  0x4d   :  { %v1904_v32 = vpack.c.bf16 %v755_v31, %v751_v30  ;;  %v1906_v35 = vpack.c.bf16 %v754_v34, %v750_v33  ;;  %v740_v6 = vld [vmem:[%s2692_s2 + $0x70] sm:$0xff]  ;;  %v745_v7 = vld [vmem:[%s2692_s2 + $0x98] sm:$0xff]  ;;  %v1624_v20 = vld [vmem:[%s2693_s3] sm:$0xf]  }
  0x4e   :  { %1899 = vmatpush1.bf16.msra.mxu0 %v1898_v25  ;;  %v749_v8 = vld [vmem:[%s2692_s2 + $0xb8] sm:$0xff]  ;;  %v1914_v9 = vpack.c.bf16 %v740_v6, %v736_v5  ;;  %v744_v11 = vld [vmem:[%s2692_s2 + $0x90] sm:$0xff]  ;;  %v1625_v21 = vunpack.c.l.bf16 %v1624_v20  ;;  %v2529_v22 = vld [vmem:[%s2693_s3 + $0x8] sm:$0xf]  ;;  %p2162_p4 = pnand %p2161_p3, %p2155_p0 }
  0x4f   :  { %1901 = vmatprep.subr.bf16.mxu0 %v1900_v26  ;;  %v1916_v10 = vpack.c.bf16 %v749_v8, %v745_v7  ;;  %v748_v12 = vld [vmem:[%s2692_s2 + $0xb0] sm:$0xff]  ;;  %v753_v13 = vld [vmem:[%s2692_s2 + $0xd8] sm:$0xff]  ;;  %v2542_v26 = vld [vmem:[%s2693_s3 + $0x20] sm:$0xf] }
  0x50   :  { %v757_v14 = vld [vmem:[%s2692_s2 + $0xf8] sm:$0xff]  ;;  %v1918_v15 = vpack.c.bf16 %v748_v12, %v744_v11  ;;  %v752_v17 = vld [vmem:[%s2692_s2 + $0xd0] sm:$0xff]  ;;  %v2547_v27 = vld [vmem:[%s2693_s3 + $0x2c] sm:$0xf] }
  0x51   :  { %v1920_v16 = vpack.c.bf16 %v757_v14, %v753_v13  ;;  %v756_v18 = vld [vmem:[%s2692_s2 + $0xf0] sm:$0xff]  ;;  %v1997_v28 = vcombine.low %v2542_v26, %v2547_v27  ;;  %v944_v30 = vld [vmem:[%s2693_s3 + $0x44] sm:$0xf]  ;;  %v946_v33 = vld [vmem:[%s2693_s3 + $0x5c] sm:$0xf] }
  0x52   :  { %1903 = vmatpush1.bf16.msra.mxu0 %v1902_v29  ;;  %v1922_v19 = vpack.c.bf16 %v756_v18, %v752_v17  ;;  %v2534_v23 = vld [vmem:[%s2693_s3 + $0x14] sm:$0xf]  ;;  %v943_v29 = vld [vmem:[%s2693_s3 + $0x38] sm:$0xf]  ;;  %v960_v60 = vunpack.c.l.bf16 %v944_v30 }
  0x53   :  { %1905 = vmatprep.subr.bf16.mxu0 %v1904_v32  ;;  %v1996_v25 = vcombine.low %v2529_v22, %v2534_v23  ;;  %v1998_v31 = vcombine.low %v943_v29, %v944_v30  ;;  %v945_v32 = vld [vmem:[%s2693_s3 + $0x50] sm:$0xf]  ;;  %v948_v36 = vld [vmem:[%s2693_s3 + $0x74] sm:$0xf]  ;;  %v959_v59 = vunpack.c.l.bf16 %v943_v29 }
  0x54   :  { %v1999_v34 = vcombine.low %v945_v32, %v946_v33 }
  0x55   :  { %1926 = vmatpush3.bf16.msra.mxu1 %v1996_v25  ;;  %v2033_v0 = vpack.i.bf16 %v960_v60, %v959_v59 }
  0x56   :  { %1907 = vmatpush1.bf16.msra.mxu0 %v1906_v35  ;;  %1927 = vmatprep.subr.bf16.mxu1 %v2180_v24  ;;  %v947_v35 = vld [vmem:[%s2693_s3 + $0x68] sm:$0xf] }
  0x57   :  { %1909 = vmatprep.subr.bf16.mxu0 %v1908_v38  ;;  %v2000_v37 = vcombine.low %v947_v35, %v948_v36  ;;  %v949_v38 = vld [vmem:[%s2693_s3 + $0x80] sm:$0xf]  ;;  %2034 = vrot.lane.b32.xlu1 %v2033_v0, %s2181_s17 }
  0x58   :  { %v965_v5 = vunpack.c.l.bf16 %v949_v38 }
  0x59   :  { %1929 = vmatpush3.bf16.msra.mxu1 %v1997_v28 }
  0x5a   :  { %1930 = vmatprep.subr.bf16.mxu1 %v2180_v24 }
  0x5d   :  { %1932 = vmatpush3.bf16.msra.mxu1 %v1998_v31 }
  0x5e   :  { %1933 = vmatprep.subr.bf16.mxu1 %v2180_v24 }
  0x61   :  { %1935 = vmatpush3.bf16.msra.mxu1 %v1999_v34 }
  0x62   :  { %1936 = vmatprep.subr.bf16.mxu1 %v2180_v24 }
  0x65   :  { %1938 = vmatpush3.bf16.msra.mxu1 %v2000_v37 }
  0x66   :  { %1939 = vmatprep.subr.bf16.mxu1 %v2180_v24 }
  0xf6   :  { %v1643_v40 = vpop.f32.mrb[0].mxu0 }
  0xf7   :  { %v1665_v41 = vpop.f32.mrb[0].mxu1  ;;  %v1644_v42 = vpop.f32.mrb[1].mxu0 }
  0xf8   :  { %v1666_v43 = vpop.f32.mrb[1].mxu1  ;;  %v1645_v44 = vadd.f32 %v1644_v42, %v1643_v40  ;;  %v1646_v46 = vpop.f32.mrb[2].mxu0  ;;  %v950_v40 = vld [vmem:[%s2693_s3 + $0x8c] sm:$0xf]  ;;  %v951_v42 = vld [vmem:[%s2693_s3 + $0x98] sm:$0xf] }
  0xf9   :  { %v1667_v45 = vadd.f32 %v1666_v43, %v1665_v41  ;;  %v1668_v47 = vpop.f32.mrb[2].mxu1  ;;  %v1647_v48 = vpop.f32.mrb[3].mxu0  ;;  %v2001_v41 = vcombine.low %v949_v38, %v950_v40  ;;  %v952_v43 = vld [vmem:[%s2693_s3 + $0xa4] sm:$0xf]  ;;  %v966_v6 = vunpack.c.l.bf16 %v950_v40  ;;  %v967_v8 = vunpack.c.l.bf16 %v951_v42 }
  0xfa   :  { %v1669_v49 = vpop.f32.mrb[3].mxu1 }
  0xfb   :  { %v641_v50 = vadd.f32 %v1667_v45, %v1645_v44  ;;  %1941 = vmatpush3.bf16.msra.mxu1 %v2001_v41  ;;  %v2002_v44 = vcombine.low %v951_v42, %v952_v43  ;;  %v953_v49 = vld [vmem:[%s2693_s3 + $0xb0] sm:$0xf]  ;;  %v2618_v41 = vld [vmem:[%s2694_s4] sm:$0xf] }
  0xfc   :  { %1942 = vmatprep.subr.bf16.mxu1 %v2180_v24  ;;  %v969_v11 = vunpack.c.l.bf16 %v953_v49 }
  0xff   :  { %1944 = vmatpush3.bf16.msra.mxu1 %v2002_v44 }
 0x100   :  { %1945 = vmatprep.subr.bf16.mxu1 %v2180_v24 }
 0x116   :  { %v1687_v51 = vpop.f32.mrb[4].mxu0 }
 0x117   :  { %v1709_v52 = vpop.f32.mrb[4].mxu1  ;;  %v1688_v53 = vpop.f32.mrb[5].mxu0 }
 0x118   :  { %v1710_v54 = vpop.f32.mrb[5].mxu1  ;;  %v1689_v55 = vadd.f32 %v1688_v53, %v1687_v51  ;;  %v1690_v57 = vpop.f32.mrb[6].mxu0 }
 0x119   :  { %v1711_v56 = vadd.f32 %v1710_v54, %v1709_v52  ;;  %v1712_v58 = vpop.f32.mrb[6].mxu1  ;;  %v1691_v61 = vpop.f32.mrb[7].mxu0  ;;  %v957_v57 = vunpack.c.l.bf16 %v2542_v26 }
 0x11a   :  { %v1713_v62 = vpop.f32.mrb[7].mxu1  ;;  %v681_v1 = vadd.f32 %v1689_v55, %v641_v50  ;;  %v954_v50 = vld [vmem:[%s2693_s3 + $0xbc] sm:$0xf]  ;;  %v955_v55 = vunpack.c.l.bf16 %v2529_v22  ;;  %v958_v58 = vunpack.c.l.bf16 %v2547_v27  ;;  %v961_v61 = vunpack.c.l.bf16 %v945_v32 }
 0x11b   :  { %v2003_v51 = vcombine.low %v953_v49, %v954_v50  ;;  %v962_v62 = vunpack.c.l.bf16 %v946_v33  ;;  %v970_v12 = vunpack.c.l.bf16 %v954_v50 }
 0x11c   :  { %v721_v3 = vadd.f32 %v1711_v56, %v681_v1  ;;  %v956_v56 = vunpack.c.l.bf16 %v2534_v23  ;;  %v2028_v1 = vpack.i.bf16 %v958_v58, %v957_v57 }
 0x11d   :  { %1947 = vmatpush3.bf16.msra.mxu1 %v2003_v51  ;;  %v2058_v14 = vpack.i.bf16 %v970_v12, %v969_v11 }
 0x11e   :  { %1618 = vmatmul.mubr.msk.f32.vlgmr.msra.gmra.mrb[8].mxu0 %vm758_vm0, %v721_v3  ;;  %1852 = vmatprep.subr.mxu1 %v2178_v39  ;;  %v2023_v63 = vpack.i.bf16 %v956_v56, %v955_v55 }
 0x11f   :  { %1911 = vmatpush1.bf16.msra.mxu0 %v1910_v2  ;;  %897 = vmatprep.mubr.f32.mxu0 %v2178_v39  ;;  %v963_v2 = vunpack.c.l.bf16 %v947_v35 }
 0x120   :  { %1913 = vmatprep.subr.bf16.mxu0 %v1912_v4  ;;  %2024 = vrot.lane.b32.xlu0 %v2023_v63, %s2181_s17  ;;  %v2038_v4 = vpack.i.bf16 %v962_v62, %v961_v61 }
 0x122   :  { %2039 = vrot.lane.b32.xlu1 %v2038_v4, %s2181_s17 }
 0x123   :  { %1915 = vmatpush1.bf16.msra.mxu0 %v1914_v9  ;;  %v968_v9 = vunpack.c.l.bf16 %v952_v43 }
 0x124   :  { %1917 = vmatprep.subr.bf16.mxu0 %v1916_v10  ;;  %2029 = vrot.lane.b32.xlu0 %v2028_v1, %s2181_s17  ;;  %v2048_v10 = vpack.i.bf16 %v966_v6, %v965_v5 }
 0x125   :  { %v2053_v13 = vpack.i.bf16 %v968_v9, %v967_v8 }
 0x126   :  { %2049 = vrot.lane.b32.xlu1 %v2048_v10, %s2181_s17 }
 0x127   :  { %1919 = vmatpush1.bf16.msra.mxu0 %v1918_v15 }
 0x128   :  { %1921 = vmatprep.subr.bf16.mxu0 %v1920_v16 }
 0x12a   :  { %2059 = vrot.lane.b32.xlu1 %v2058_v14, %s2181_s17 }
 0x12b   :  { %1923 = vmatpush1.bf16.msra.mxu0 %v1922_v19 }
 0x12c   :  { %1772 = vmatprep.subr.mxu0 %v2178_v39 }
 0x12e   :  { %1619 = vmatmul.mubr.msk.f32.vlgmr.msra.gmra.mrb[10].mxu0 %vm758_vm0, %v721_v3  ;;  %v964_v3 = vunpack.c.l.bf16 %v948_v36  ;;  %v1138_v36 = vlaneseq }
 0x12f   :  { %1773 = vmatpush3.msra.mxu0 %v1625_v21  ;;  %1774 = vmatprep.mubr.msk.f32.mxu0 %vm2179_vm1, %v2178_v39 }
 0x130   :  { %1812 = vmatprep.subr.mxu0 %v2178_v39  ;;  %v2043_v7 = vpack.i.bf16 %v964_v3, %v963_v2  ;;  %v2612_v38 = vshrl.u32 %v1138_v36, 7 }
 0x132   :  { %2044 = vrot.lane.b32.xlu0 %v2043_v7, %s2181_s17  ;;  %v1140_v40 = vsub.s32 0, %v2612_v38  ;;  %v1145_v42 = vsub.s32 2, %v2612_v38 }
 0x134   :  { %v1141_v44 = vrot.slane %v2618_v41, %v1140_v40  ;;  %v1146_v51 = vrot.slane %v2618_v41, %v1145_v42 }
 0x136   :  { %2054 = vrot.lane.b32.xlu0 %v2053_v13, %s2181_s17 }
 0x192   :  { %v2025_v43 = vpop.permute.xlu0 %2024 }
 0x193   :  { %v2026_v49 = vunpack.i.l.bf16 %v2025_v43 }
 0x1f1   :  { %v828_v45 = vpop.f32.mrb[8].mxu0 }
 0x1f2   :  { %v2588_v46 = vpop.f32.mrb[9].mxu0 }
 0x201   :  { %v2590_v47 = vpop.f32.mrb[10].mxu0 }
 0x202   :  { %v901_v48 = vpop.f32.mrb[11].mxu0 }
 0x203   :  { %1775 = vmatmul.mubr.msk.f32.vlgmr.msra.gmra.mrb[12].mxu0 %vm971_vm2, %v901_v48  ;;  %v2027_v48 = vunpack.i.h.bf16 %v2025_v43 }
 0x204   :  { %1813 = vmatpush3.msra.mxu0 %v1625_v21  ;;  %1814 = vmatprep.mubr.msk.f32.mxu0 %vm2179_vm1, %v2178_v39 }
 0x205   :  { %1948 = vmatprep.subr.bf16.mxu0 %v2180_v24  ;;  %v1949_v55 = vpack.c.bf16 %v2027_v48, %v2026_v49  ;;  %v1379_v48 = vsub.s32 1, %v2612_v38  ;;  %v1384_v49 = vsub.s32 3, %v2612_v38  ;;  %v2143_v38 = vld [vmem:[%s2693_s3 + $0x1c] ss:$12 sps:$4 sm:$0xff]  }
 0x2d6   :  { %v1041_v52 = vpop.f32.mrb[12].mxu0 }
 0x2d7   :  { %v1045_v53 = vmul.f32 %v1041_v52, %v828_v45  ;;  %v1776_v54 = vpop.f32.mrb[13].mxu0  ;;  %v2030_v52 = vpop.permute.xlu0 %2029 }
 0x2d8   :  { %v2035_v54 = vpop.permute.xlu1 %2034  ;;  %v2032_v56 = vunpack.i.h.bf16 %v2030_v52  ;;  %v2031_v57 = vunpack.i.l.bf16 %v2030_v52 }
 0x2d9   :  { %1810 = vmatmul.mubr.f32.vlgmr.msra.gmra.mrb[8].mxu1 %v1045_v53  ;;  %v2037_v60 = vunpack.i.h.bf16 %v2035_v54  ;;  %v2036_v61 = vunpack.i.l.bf16 %v2035_v54  ;;  %v2016_v54 = vld [vmem:[%s2693_s3 + $0x4] sm:$0xf] }
 0x2da   :  { %1853 = vmatpush3.msra.mxu1 %v1625_v21  ;;  %1854 = vmatprep.mubr.msk.f32.mxu1 %vm2179_vm1, %v2178_v39  ;;  %v1952_v59 = vpack.c.bf16 %v2032_v56, %v2031_v57 }
 0x2db   :  { %1972 = vmatprep.subr.bf16.mxu1 %v2180_v24  ;;  %v1955_v63 = vpack.c.bf16 %v2037_v60, %v2036_v61  ;;  %v2045_v2 = vpop.permute.xlu0 %2044  ;;  %v2147_v60 = vld [vmem:[%s2693_s3 + $0x7c] ss:$12 sps:$4 sm:$0xff]   ;;  %v2148_v61 = vld [vmem:[%s2693_s3 + $0x94] ss:$12 sps:$4 sm:$0xff]  }
 0x2dc   :  { %v2040_v62 = vpop.permute.xlu1 %2039  ;;  %v2047_v4 = vunpack.i.h.bf16 %v2045_v2  ;;  %v2046_v5 = vunpack.i.l.bf16 %v2045_v2 }
 0x2dd   :  { %v2042_v0 = vunpack.i.h.bf16 %v2040_v62  ;;  %v2041_v1 = vunpack.i.l.bf16 %v2040_v62  ;;  %v2149_v62 = vld [vmem:[%s2693_s3 + $0xac] ss:$12 sps:$4 sm:$0xff]  }
 0x2de   :  { %v1961_v7 = vpack.c.bf16 %v2047_v4, %v2046_v5 }
 0x2df   :  { %v1958_v3 = vpack.c.bf16 %v2042_v0, %v2041_v1  ;;  %v2055_v10 = vpop.permute.xlu0 %2054 }
 0x2e0   :  { %v2050_v6 = vpop.permute.xlu1 %2049  ;;  %v2057_v12 = vunpack.i.h.bf16 %v2055_v10  ;;  %v2056_v13 = vunpack.i.l.bf16 %v2055_v10 }
 0x2e1   :  { %v2052_v8 = vunpack.i.h.bf16 %v2050_v6  ;;  %v2051_v9 = vunpack.i.l.bf16 %v2050_v6 }
 0x2e3   :  { %v1964_v11 = vpack.c.bf16 %v2052_v8, %v2051_v9 }
 0x2e4   :  { %v2060_v14 = vpop.permute.xlu1 %2059 }
 0x3ac   :  { %v1112_v15 = vpop.f32.mrb[8].mxu1 }
 0x3ad   :  { %v1116_v16 = vsel %vm971_vm2, %v1112_v15, 0.0  ;;  %v1811_v17 = vpop.f32.mrb[9].mxu1 }
 0x3ae   :  { %v1117_v18 = vrot.slane %v1116_v16, 4  ;;  %v2061_v17 = vunpack.i.l.bf16 %v2060_v14 }
 0x3b0   :  { %v1118_v19 = vadd.f32 %v1117_v18, %v1116_v16  ;;  %v2062_v16 = vunpack.i.h.bf16 %v2060_v14 }
 0x3b2   :  { %v1119_v20 = vrot.slane %v1118_v19, 2  ;;  %v1970_v18 = vpack.c.bf16 %v2062_v16, %v2061_v17 }
 0x3b4   :  { %v1120_v21 = vadd.f32 %v1119_v20, %v1118_v19 }
 0x3b6   :  { %v1121_v22 = vrot.slane %v1120_v21, 1 }
 0x3b8   :  { %v1122_v23 = vadd.f32 %v1121_v22, %v1120_v21 }
 0x3ba   :  { %v1124_v25 = vmul.f32 0.125, %v1122_v23 }
 0x3bc   :  { %v1125_v26 = vsub.f32 %v1112_v15, %v1124_v25  ;;  %v1967_v15 = vpack.c.bf16 %v2057_v12, %v2056_v13 }
 0x3be   :  { %v1126_v27 = vmul.f32 %v1125_v26, %v1125_v26 }
 0x3c0   :  { %v1127_v28 = vsel %vm971_vm2, %v1126_v27, 0.0 }
 0x3c1   :  { %v1128_v29 = vrot.slane %v1127_v28, 4 }
 0x3c3   :  { %v1129_v30 = vadd.f32 %v1128_v29, %v1127_v28 }
 0x3c5   :  { %v1130_v31 = vrot.slane %v1129_v30, 2 }
 0x3c7   :  { %v1131_v32 = vadd.f32 %v1130_v31, %v1129_v30 }
 0x3c9   :  { %v1132_v33 = vrot.slane %v1131_v32, 1 }
 0x3cb   :  { %v1133_v34 = vadd.f32 %v1132_v33, %v1131_v32 }
 0x3cd   :  { %v1134_v35 = vmul.f32 0.125, %v1133_v34 }
 0x3cf   :  { %v1135_v37 = vadd.f32 1e-05, %v1134_v35 }
 0x3d1   :  { %2150 = vrsqrt.f32 %v1135_v37 }
 0x3db   :  { %v2151_v45 = vpop.eup %2150 }
 0x3dc   :  { %v1137_v50 = vmul.f32 %v2151_v45, %v1125_v26 }
 0x3de   :  { %v1142_v53 = vmul.f32 %v1141_v44, %v1137_v50  ;;  %v1380_v50 = vrot.slane %v2618_v41, %v1379_v48 }
 0x3e0   :  { %v1147_v58 = vadd.f32 %v1146_v51, %v1142_v53  ;;  %v1385_v53 = vrot.slane %v2618_v41, %v1384_v49  ;;  %v2144_v41 = vld [vmem:[%s2693_s3 + $0x34] ss:$12 sps:$4 sm:$0xff]  }
 0x3e2   :  { %1815 = vmatmul.mubr.msk.f32.vlgmr.msra.gmra.mrb[14].mxu0 %vm971_vm2, %v1147_v58 }
 0x3e3   :  { %1950 = vmatpush3.bf16.msra.mxu0 %v1949_v55  ;;  %1849 = vmatprep.mubr.msk.f32.mxu0 %vm2179_vm1, %v2178_v39  ;;  %v2017_v55 = vld [vmem:[%s2693_s3 + $0xc] sm:$0xf0] }
 0x3e4   :  { %1951 = vmatprep.subr.bf16.mxu0 %v2180_v24  ;;  %v2008_v57 = vor.u32 %v2017_v55, %v2016_v54 }
 0x3e7   :  { %1953 = vmatpush3.bf16.msra.mxu0 %v1952_v59  ;;  %v2145_v59 = vld [vmem:[%s2693_s3 + $0x4c] ss:$12 sps:$4 sm:$0xff]  }
 0x3e8   :  { %1954 = vmatprep.subr.bf16.mxu0 %v2180_v24 }
 0x3eb   :  { %1956 = vmatpush3.bf16.msra.mxu0 %v1955_v63 }
 0x3ec   :  { %1957 = vmatprep.subr.bf16.mxu0 %v2180_v24 }
 0x3ef   :  { %1959 = vmatpush3.bf16.msra.mxu0 %v1958_v3 }
 0x3f0   :  { %1960 = vmatprep.subr.bf16.mxu0 %v2180_v24 }
 0x3f3   :  { %1962 = vmatpush3.bf16.msra.mxu0 %v1961_v7 }
 0x3f4   :  { %1963 = vmatprep.subr.bf16.mxu0 %v2180_v24 }
 0x3f7   :  { %1965 = vmatpush3.bf16.msra.mxu0 %v1964_v11 }
 0x3f8   :  { %1966 = vmatprep.subr.bf16.mxu0 %v2180_v24 }
 0x3fb   :  { %1968 = vmatpush3.bf16.msra.mxu0 %v1967_v15 }
 0x3fc   :  { %1969 = vmatprep.subr.bf16.mxu0 %v2180_v24 }
 0x3ff   :  { %1971 = vmatpush3.bf16.msra.mxu0 %v1970_v18 }
 0x4b5   :  { %v1217_v19 = vpop.f32.mrb[14].mxu0 }
 0x4b6   :  { %v1221_v20 = vmul.f32 %v1217_v19, %v2588_v46  ;;  %v1816_v21 = vpop.f32.mrb[15].mxu0 }
 0x4b8   :  { %1850 = vmatmul.mubr.f32.vlgmr.msra.gmra.mrb[16].mxu0 %v1221_v20 }
 0x58b   :  { %v1352_v22 = vpop.f32.mrb[16].mxu0 }
 0x58c   :  { %v1356_v23 = vsel %vm971_vm2, %v1352_v22, 0.0  ;;  %v1851_v25 = vpop.f32.mrb[17].mxu0 }
 0x58d   :  { %v1357_v26 = vrot.slane %v1356_v23, 4 }
 0x58f   :  { %v1358_v27 = vadd.f32 %v1357_v26, %v1356_v23 }
 0x591   :  { %v1359_v28 = vrot.slane %v1358_v27, 2 }
 0x593   :  { %v1360_v29 = vadd.f32 %v1359_v28, %v1358_v27 }
 0x595   :  { %v1361_v30 = vrot.slane %v1360_v29, 1 }
 0x597   :  { %v1362_v31 = vadd.f32 %v1361_v30, %v1360_v29 }
 0x599   :  { %v1363_v32 = vmul.f32 0.125, %v1362_v31 }
 0x59b   :  { %v1364_v33 = vsub.f32 %v1352_v22, %v1363_v32 }
 0x59d   :  { %v1365_v34 = vmul.f32 %v1364_v33, %v1364_v33 }
 0x59f   :  { %v1366_v35 = vsel %vm971_vm2, %v1365_v34, 0.0 }
 0x5a0   :  { %v1367_v36 = vrot.slane %v1366_v35, 4 }
 0x5a2   :  { %v1368_v37 = vadd.f32 %v1367_v36, %v1366_v35 }
 0x5a4   :  { %v1369_v46 = vrot.slane %v1368_v37, 2 }
 0x5a6   :  { %v1370_v40 = vadd.f32 %v1369_v46, %v1368_v37 }
 0x5a8   :  { %v1371_v42 = vrot.slane %v1370_v40, 1 }
 0x5aa   :  { %v1372_v43 = vadd.f32 %v1371_v42, %v1370_v40 }
 0x5ac   :  { %v1373_v44 = vmul.f32 0.125, %v1372_v43 }
 0x5ae   :  { %v1374_v45 = vadd.f32 1e-05, %v1373_v44 }
 0x5b0   :  { %2152 = vrsqrt.f32 %v1374_v45 }
 0x5ba   :  { %v2153_v51 = vpop.eup %2152 }
 0x5bb   :  { %v1376_v52 = vmul.f32 %v2153_v51, %v1364_v33 }
 0x5bd   :  { %v1381_v56 = vmul.f32 %v1380_v50, %v1376_v52 }
 0x5bf   :  { %v1386_v58 = vadd.f32 %v1385_v53, %v1381_v56 }
 0x5c1   :  { %1855 = vmatmul.mubr.msk.f32.vlgmr.msra.gmra.mrb[10].mxu1 %vm971_vm2, %v1386_v58 }
 0x5c2   :  { %1974 = vmatpush3.bf16.msra.mxu1 %v2008_v57  ;;  %1889 = vmatprep.mubr.msk.f32.mxu1 %vm2179_vm1, %v2178_v39  ;;  %v2146_v39 = vld [vmem:[%s2693_s3 + $0x64] ss:$12 sps:$4 sm:$0xff]  }
 0x5c3   :  { %1975 = vmatprep.subr.bf16.mxu1 %v2180_v24 }
 0x5c6   :  { %1977 = vmatpush3.bf16.msra.mxu1 %v2143_v38 }
 0x5c7   :  { %1978 = vmatprep.subr.bf16.mxu1 %v2180_v24 }
 0x5ca   :  { %1980 = vmatpush3.bf16.msra.mxu1 %v2144_v41 }
 0x5cb   :  { %1981 = vmatprep.subr.bf16.mxu1 %v2180_v24 }
 0x5ce   :  { %1983 = vmatpush3.bf16.msra.mxu1 %v2145_v59 }
 0x5cf   :  { %1984 = vmatprep.subr.bf16.mxu1 %v2180_v24 }
 0x5d2   :  { %1986 = vmatpush3.bf16.msra.mxu1 %v2146_v39 }
 0x5d3   :  { %1987 = vmatprep.subr.bf16.mxu1 %v2180_v24 }
 0x5d6   :  { %1989 = vmatpush3.bf16.msra.mxu1 %v2147_v60 }
 0x5d7   :  { %1990 = vmatprep.subr.bf16.mxu1 %v2180_v24 }
 0x5da   :  { %1992 = vmatpush3.bf16.msra.mxu1 %v2148_v61 }
 0x5db   :  { %1993 = vmatprep.subr.bf16.mxu1 %v2180_v24 }
 0x5de   :  { %1995 = vmatpush3.bf16.msra.mxu1 %v2149_v62 }
 0x694   :  { %v1456_v63 = vpop.f32.mrb[10].mxu1 }
 0x695   :  { %v1460_v0 = vmul.f32 %v1456_v63, %v2590_v47  ;;  %v1856_v1 = vpop.f32.mrb[11].mxu1 }
 0x697   :  { %1890 = vmatmul.mubr.f32.vlgmr.msra.gmra.mrb[12].mxu1 %v1460_v0 }
 0x76a   :  { %v1527_v2 = vpop.f32.mrb[12].mxu1 }
 0x76b   :  { %1531 = vst [vmem:[#allocation2] sm:$0xff] %v1527_v2  ;;  %v1891_v3 = vpop.f32.mrb[13].mxu1 }
 0x76c   :  { %2165 = shalt.err (!%p2162_p4)
}
 0x76d   :  { %s2166_s2 = scalar_lea.hbm %s2695_s5, 128 }
 0x76e   :  { %p2167_p5 = scmp.ne.s32.totalorder %s2695_s5, %s2166_s2  ;;  %p2170_p6 = scmp.lt.u32.totalorder %s2166_s2, %s2695_s5 }
 0x770   :  { %p2172_p7 = pnand %p2170_p6, %p2167_p5 }
 0x772   :  { %2175 = shalt.err (!%p2172_p7)
}
 0x773   :  { %1541 = dma.vmem_to_hbm [thread:$0]  %s1539_s11, 128, %s2695_s5, [#allocation3]  }
 0x774   :  { %2176 = dma.done.wait [#allocation3], 128  }
 0x775   :  { %2177 = vsyncadd [#allocation3], 4294967168 }
 0x776   :  { %1545 = vsyncpa [#allocation3], 1 }

</bundles_post_ra>
